<compile_context>
chip_gen: v7x
topology: tpu7x:2x2x1
jax: 0.10.0
libtpu: 0.0.40
codegen_flags: <defaults>
</compile_context>

<pallas_src>
from functools import partial

import numpy as np
import jax
import jax.numpy as jnp
from jax.experimental import pallas as pl
from jax.experimental.pallas import tpu as pltpu


# ----------------------------- parameter setup -----------------------------
def _C(x):
    return 1.0 / np.sqrt(2.0) if x == 0 else 1.0


def make_dct_matrices(p):
    """2-D DCT basis P (p^2 x p^2) exactly as in the PyTorch __init__."""
    P = np.zeros((p * p, p * p), dtype=np.float64)
    for x in range(p):
        for y in range(p):
            for i in range(p):
                for j in range(p):
                    P[x * p + y, i * p + j] += (
                        2.0 / p * _C(i) * _C(j)
                        * np.cos((2 * x + 1) * i * np.pi / (2 * p))
                        * np.cos((2 * y + 1) * j * np.pi / (2 * p))
                    )
    P = P.astype(np.float32)
    return P, P.T.copy()          # (P, Pm1)


# ------------------------------- Pallas kernel ------------------------------
def _dct_denoise_kernel(sigma_ref, pm1_ref, p_ref, patches_ref, out_ref, w_ref):
    # sigma_ref:   (1,)       f32  SMEM scalar
    # pm1_ref:     (p2, p2)   f32  forward DCT  (P^T), VMEM-resident
    # p_ref:       (p2, p2)   f32  inverse DCT  (P),  VMEM-resident
    # patches_ref: (p2, TL)   f32  lane tile of unfolded patches
    # out_ref:     (p2, TL)   f32  weighted reconstructed patches
    # w_ref:       (1, TL)    f32  per-patch aggregation weight
    thr = 3.0 * sigma_ref[0]

    # forward DCT of every patch (MXU)
    d = jnp.dot(pm1_ref[...], patches_ref[...],
                preferred_element_type=jnp.float32)

    # hardshrink(1.0) in the normalized domain == keep where |d| > 3*sigma
    d = jnp.where(jnp.abs(d) > thr, d, 0.0)

    # count nonzero coefficients excluding the DC row (row 0):
    # count all rows, then subtract row 0's indicator (no iota / row mask).
    nz = (d != 0.0).astype(jnp.float32)
    count = jnp.sum(nz, axis=0, keepdims=True) - nz[0:1, :]     # (1, TL)
    w = 1.0 / (1.0 + count)                                     # (1, TL)

    # inverse DCT (MXU) and adaptive per-patch weighting
    rec = jnp.dot(p_ref[...], d, preferred_element_type=jnp.float32)
    out_ref[...] = rec * w
    w_ref[...] = w


def _choose_lane_tile(p2, nl):
    """Lane-tile size: multiple of 128, capped so double-buffered tiles fit
    comfortably inside v7x's 64 MiB VMEM (and trivially inside v5e/v6e)."""
    nl128 = ((nl + 127) // 128) * 128
    tl_max = 8192 if p2 <= 64 else 2048
    return min(nl128, tl_max)


def _run_dct_kernel(sigma, Pm1, P, patches_flat, tl):
    p2, nl_pad = patches_flat.shape
    num_tiles = nl_pad // tl
    sigma_arr = jnp.reshape(sigma.astype(jnp.float32), (1,))

    grid_spec = pl.GridSpec(
        grid=(num_tiles,),
        in_specs=[
            pl.BlockSpec(memory_space=pltpu.MemorySpace.SMEM),   # sigma
            pl.BlockSpec((p2, p2), lambda l: (0, 0)),            # Pm1 (resident)
            pl.BlockSpec((p2, p2), lambda l: (0, 0)),            # P   (resident)
            pl.BlockSpec((p2, tl), lambda l: (0, l)),            # patch tile
        ],
        out_specs=[
            pl.BlockSpec((p2, tl), lambda l: (0, l)),            # out patches
            pl.BlockSpec((1, tl), lambda l: (0, l)),             # weights
        ],
    )
    out_flat, w_flat = pl.pallas_call(
        _dct_denoise_kernel,
        grid_spec=grid_spec,
        out_shape=(
            jax.ShapeDtypeStruct((p2, nl_pad), jnp.float32),
            jax.ShapeDtypeStruct((1, nl_pad), jnp.float32),
        ),
        compiler_params=pltpu.CompilerParams(
            dimension_semantics=("parallel",),      # megacore shards lane tiles
            vmem_limit_bytes=48 * 1024 * 1024,
        ),
    )(sigma_arr, Pm1, P, patches_flat)
    return out_flat, w_flat


# ------------------------------- JAX glue -----------------------------------
def unfold(x, p):
    """nn.Unfold(kernel_size=p) for NCHW with C == 1 -> (p*p, N, L)."""
    N, _, H, W = x.shape
    Hout, Wout = H - p + 1, W - p + 1
    cols = [x[:, 0, i:i + Hout, j:j + Wout].reshape(N, Hout * Wout)
            for i in range(p) for j in range(p)]
    return jnp.stack(cols, axis=0)                  # (p^2, N, L)


def fold(patches, H, W, p):
    """F.fold(..., output_size=(H, W), kernel_size=p): overlap-add.
    patches: (p^2, N, L) -> (N, 1, H, W)."""
    p2, N, L = patches.shape
    Hout, Wout = H - p + 1, W - p + 1
    pr = patches.reshape(p, p, N, Hout, Wout)
    out = jnp.zeros((N, 1, H, W), patches.dtype)
    for i in range(p):
        for j in range(p):
            out = out.at[:, 0, i:i + Hout, j:j + Wout].add(pr[i, j])
    return out


def fold_weights(w, H, W, p):
    """fold(w * ones_patches) without materializing the (p^2, N, L) broadcast.
    w: (N, L) -> (N, 1, H, W)."""
    N, L = w.shape
    Hout, Wout = H - p + 1, W - p + 1
    w_img = w.reshape(N, Hout, Wout)
    out = jnp.zeros((N, 1, H, W), w.dtype)
    for i in range(p):
        for j in range(p):
            out = out.at[:, 0, i:i + Hout, j:j + Wout].add(w_img)
    return out


@partial(jax.jit, static_argnames=("p",))
def _dct_denoiser_forward(x, sigma, P, Pm1, p):
    N, _, H, W = x.shape
    p2 = p * p
    Hout, Wout = H - p + 1, W - p + 1
    L = Hout * Wout
    nl = N * L

    patches = unfold(x, p)                           # (p^2, N, L)
    flat = patches.reshape(p2, nl)                   # batch folded into lanes

    tl = _choose_lane_tile(p2, nl)
    nl_pad = pl.cdiv(nl, tl) * tl
    if nl_pad > nl:
        flat = jnp.pad(flat, ((0, 0), (0, nl_pad - nl)))

    out_flat, w_flat = _run_dct_kernel(sigma, Pm1, P, flat, tl)

    # drop padded columns before the overlap-add (padded cols would corrupt it)
    out_flat = out_flat[:, :nl]
    w_flat = w_flat[:, :nl]

    rec = out_flat.reshape(p2, N, L)
    w = w_flat.reshape(N, L)

    num = fold(rec, H, W, p)                         # (N, 1, H, W)
    div = fold_weights(w, H, W, p)                   # (N, 1, H, W)
    return num / div


class DCTDenoiser:
    """JAX/Pallas port of the PyTorch DCT_denoiser module.

    NOTE: the PyTorch `x *= w` broadcast is only well-defined for N == 1; here
    the per-patch weight is applied per (batch, patch) column, which matches
    the torch module exactly for N == 1 and extends it naturally to N > 1.
    """

    def __init__(self, patch_size=16):
        self.patch_size = patch_size
        P, Pm1 = make_dct_matrices(patch_size)
        self.P = jnp.asarray(P)
        self.Pm1 = jnp.asarray(Pm1)

    def __call__(self, x, sigma):
        return _dct_denoiser_forward(
            x, jnp.asarray(sigma, jnp.float32), self.P, self.Pm1,
            self.patch_size)


# ------------------------------- reference ----------------------------------
def reference(x, sigma, P, Pm1, p):
    """Pure-JAX mirror of the PyTorch forward (per-patch weighting)."""
    N, _, H, W = x.shape
    pat = unfold(x, p)                               # (p^2, N, L)
    d = jnp.einsum("ab,bnl->anl", Pm1, pat)
    d = d / (3.0 * sigma)
    d = jnp.where(jnp.abs(d) > 1.0, d, 0.0)          # Hardshrink(1.0)
    d = d * (3.0 * sigma)
    cnt = jnp.sum((d[1:] != 0.0).astype(jnp.float32), axis=0)    # (N, L)
    w = 1.0 / (1.0 + cnt)                                        # (N, L)
    rec = jnp.einsum("ab,bnl->anl", P, d) * w[None, :, :]
    num = fold(rec, H, W, p)
    div = fold_weights(w, H, W, p)
    return num / div


# --------------------------------- main --------------------------------------
if __name__ == "__main__":
    patch_size = 8
    N, C, H, W = 2, 1, 16, 16          # module requires C == 1
    sigma = 0.1

    key = jax.random.PRNGKey(0)
    x = jax.random.normal(key, (N, C, H, W), dtype=jnp.float32)

    model = DCTDenoiser(patch_size=patch_size)
    out = model(x, sigma)
    out = jax.block_until_ready(out)

    ref = jax.block_until_ready(
        reference(x, sigma, model.P, model.Pm1, patch_size))

    assert out.shape == (N, 1, H, W)
    assert bool(jnp.allclose(out, ref, atol=1e-4, rtol=1e-4))
    print("KERNEL_OK")
</pallas_src>

<mosaic_0001>
module attributes {stable_mosaic.version = 11 : i64} {
  func.func @_dct_denoise_kernel(%arg0: i32, %arg1: memref<1xf32, #tpu.memory_space<smem>>, %arg2: memref<64x64xf32, #tpu.memory_space<vmem>>, %arg3: memref<64x64xf32, #tpu.memory_space<vmem>>, %arg4: memref<64x256xf32, #tpu.memory_space<vmem>>, %arg5: memref<64x256xf32, #tpu.memory_space<vmem>>, %arg6: memref<1x256xf32, #tpu.memory_space<vmem>>) attributes {dimension_semantics = [#tpu.dimension_semantics<parallel>], iteration_bounds = array<i64: 1>, scalar_prefetch = 0 : i64, scratch_operands = 0 : i64, tpu.core_type = #tpu.core_type<tc>, window_params = [{transform_indices = @transform_0, window_bounds = array<i64: 1>}, {pipeline_mode = #tpu.pipeline_mode<synchronous>, transform_indices = @transform_1, window_bounds = array<i64: 64, 64>}, {pipeline_mode = #tpu.pipeline_mode<synchronous>, transform_indices = @transform_2, window_bounds = array<i64: 64, 64>}, {transform_indices = @transform_3, window_bounds = array<i64: 64, 256>}, {transform_indices = @transform_4, window_bounds = array<i64: 64, 256>}, {transform_indices = @transform_5, window_bounds = array<i64: 1, 256>}]} {
    %c0 = arith.constant 0 : index
    %0 = memref.load %arg1[%c0] : memref<1xf32, #tpu.memory_space<smem>>
    %cst = arith.constant 3.000000e+00 : f32
    %1 = arith.mulf %cst, %0 : f32
    %c0_0 = arith.constant 0 : index
    %c0_1 = arith.constant 0 : index
    %2 = vector.load %arg2[%c0_0, %c0_1] : memref<64x64xf32, #tpu.memory_space<vmem>>, vector<64x64xf32>
    %c0_2 = arith.constant 0 : index
    %c0_3 = arith.constant 0 : index
    %3 = vector.load %arg4[%c0_2, %c0_3] : memref<64x256xf32, #tpu.memory_space<vmem>>, vector<64x256xf32>
    %cst_4 = arith.constant dense<0.000000e+00> : vector<64x256xf32>
    %4 = tpu.matmul %2, %3, %cst_4 {dimension_numbers = #tpu.dot_dimension_numbers<[1], [0], [0], [1], [0, 0, 1, 1], [], []>} : vector<64x64xf32>, vector<64x256xf32>, vector<64x256xf32> -> vector<64x256xf32>
    %5 = math.absf %4 : vector<64x256xf32>
    %6 = vector.broadcast %1 : f32 to vector<64x256xf32>
    %7 = arith.cmpf ogt, %5, %6 : vector<64x256xf32>
    %cst_5 = arith.constant 0.000000e+00 : f32
    %8 = vector.broadcast %cst_5 : f32 to vector<64x256xf32>
    %9 = arith.select %7, %4, %8 : vector<64x256xi1>, vector<64x256xf32>
    %cst_6 = arith.constant 0.000000e+00 : f32
    %10 = vector.broadcast %cst_6 : f32 to vector<64x256xf32>
    %11 = arith.cmpf one, %9, %10 : vector<64x256xf32>
    %12 = arith.extui %11 : vector<64x256xi1> to vector<64x256xi32>
    %13 = arith.sitofp %12 : vector<64x256xi32> to vector<64x256xf32>
    %cst_7 = arith.constant dense<0.000000e+00> : vector<256xf32>
    %14 = vector.multi_reduction <add>, %13, %cst_7 [0] : vector<64x256xf32> to vector<256xf32>
    %15 = vector.shape_cast %14 : vector<256xf32> to vector<1x256xf32>
    %16 = vector.extract_strided_slice %13 {offsets = [0, 0], sizes = [1, 256], strides = [1, 1]} : vector<64x256xf32> to vector<1x256xf32>
    %17 = arith.subf %15, %16 : vector<1x256xf32>
    %cst_8 = arith.constant 1.000000e+00 : f32
    %18 = vector.broadcast %cst_8 : f32 to vector<1x256xf32>
    %19 = arith.addf %18, %17 : vector<1x256xf32>
    %cst_9 = arith.constant 1.000000e+00 : f32
    %20 = vector.broadcast %cst_9 : f32 to vector<1x256xf32>
    %21 = arith.divf %20, %19 : vector<1x256xf32>
    %c0_10 = arith.constant 0 : index
    %c0_11 = arith.constant 0 : index
    %22 = vector.load %arg3[%c0_10, %c0_11] : memref<64x64xf32, #tpu.memory_space<vmem>>, vector<64x64xf32>
    %cst_12 = arith.constant dense<0.000000e+00> : vector<64x256xf32>
    %23 = tpu.matmul %22, %9, %cst_12 {dimension_numbers = #tpu.dot_dimension_numbers<[1], [0], [0], [1], [0, 0, 1, 1], [], []>} : vector<64x64xf32>, vector<64x256xf32>, vector<64x256xf32> -> vector<64x256xf32>
    %24 = vector.broadcast %21 : vector<1x256xf32> to vector<64x256xf32>
    %25 = arith.mulf %23, %24 : vector<64x256xf32>
    %c0_13 = arith.constant 0 : index
    %c0_14 = arith.constant 0 : index
    %26 = vector.load %arg5[%c0_13, %c0_14] : memref<64x256xf32, #tpu.memory_space<vmem>>, vector<64x256xf32>
    tpu.vector_store %arg5[%c0_13, %c0_14], %25 {strides = array<i32>} : memref<64x256xf32, #tpu.memory_space<vmem>>, vector<64x256xf32>,
    %c0_15 = arith.constant 0 : index
    %c0_16 = arith.constant 0 : index
    %27 = vector.load %arg6[%c0_15, %c0_16] : memref<1x256xf32, #tpu.memory_space<vmem>>, vector<1x256xf32>
    tpu.vector_store %arg6[%c0_15, %c0_16], %21 {strides = array<i32>} : memref<1x256xf32, #tpu.memory_space<vmem>>, vector<1x256xf32>,
    return
  }
  func.func @transform_0(%arg0: i32) -> i32 {
    %c0_i32 = arith.constant 0 : i32
    %c0_i32_0 = arith.constant 0 : i32
    return %c0_i32 : i32
  }
  func.func @transform_1(%arg0: i32) -> (i32, i32) {
    %c0_i32 = arith.constant 0 : i32
    %c0_i32_0 = arith.constant 0 : i32
    %c0_i32_1 = arith.constant 0 : i32
    return %c0_i32, %c0_i32_0 : i32, i32
  }
  func.func @transform_2(%arg0: i32) -> (i32, i32) {
    %c0_i32 = arith.constant 0 : i32
    %c0_i32_0 = arith.constant 0 : i32
    %c0_i32_1 = arith.constant 0 : i32
    return %c0_i32, %c0_i32_0 : i32, i32
  }
  func.func @transform_3(%arg0: i32) -> (i32, i32) {
    %c0_i32 = arith.constant 0 : i32
    %c0_i32_0 = arith.constant 0 : i32
    return %c0_i32, %arg0 : i32, i32
  }
  func.func @transform_4(%arg0: i32) -> (i32, i32) {
    %c0_i32 = arith.constant 0 : i32
    %c0_i32_0 = arith.constant 0 : i32
    return %c0_i32, %arg0 : i32, i32
  }
  func.func @transform_5(%arg0: i32) -> (i32, i32) {
    %c0_i32 = arith.constant 0 : i32
    %c0_i32_0 = arith.constant 0 : i32
    return %c0_i32, %arg0 : i32, i32
  }
}

</mosaic_0001>

<bundles_post_ra>
// kernel: _dct_denoiser_forward.1
= control target key start
LH: loop header
LB: loop body
LE: loop exit
PB: predicated region body
PF: predicated region fallthrough
CT: control target
= control target key end

     0   :  { %v625_v3 = vmov 0.0   ;;  %vm46_vm0 = vcmask 523264   ;;  %s969_s3 = inlined_call_operand.vmem [shape: f32[64,256], index: 3, kind: input, shape index: {}]   ;;  %s970_s1 = inlined_call_operand.vmem [shape: f32[64,64], index: 1, kind: input, shape index: {}]   ;;  %s971_s0 = inlined_call_operand.<no memory space> [shape: f32[1], index: 0, kind: input, shape index: {}]   ;;  %s972_s2 = inlined_call_operand.vmem [shape: f32[64,64], index: 2, kind: input, shape index: {}]   ;;  %s973_s5 = inlined_call_operand.vmem [shape: f32[1,256], index: 5, kind: output, shape index: {1}]   ;;  %s974_s4 = inlined_call_operand.vmem [shape: f32[64,256], index: 4, kind: output, shape index: {0}]  }
   0x1   :  { %v31_v0 = vld [vmem:[%s969_s3 + $0x8] sm:$0xff]  ;;  %v33_v1 = vld [vmem:[%s969_s3 + $0x18] sm:$0xff]  ;;  %v30_v2 = vld [vmem:[%s969_s3] sm:$0xff]  ;;  %135 = vmatprep.mubr.f32.mxu0 %v625_v3  ;;  %411 = vmatprep.mubr.f32.mxu1 %v625_v3  ;;  %s21_s17 = smul.f32 3.0, %s971_s0 }
   0x2   :  { %v579_v4 = vpack.c.bf16 %v33_v1, %v31_v0  ;;  %v32_v5 = vld [vmem:[%s969_s3 + $0x10] sm:$0xff]  ;;  %v35_v6 = vld [vmem:[%s969_s3 + $0x28] sm:$0xff]  ;;  %v37_v7 = vld [vmem:[%s969_s3 + $0x38] sm:$0xff] }
   0x3   :  { %v581_v8 = vpack.c.bf16 %v32_v5, %v30_v2  ;;  %v583_v9 = vpack.c.bf16 %v37_v7, %v35_v6  ;;  %v34_v10 = vld [vmem:[%s969_s3 + $0x20] sm:$0xff]  ;;  %v36_v11 = vld [vmem:[%s969_s3 + $0x30] sm:$0xff]  ;;  %v39_v12 = vld [vmem:[%s969_s3 + $0x48] sm:$0xff]  ;;  %v749_v34 = vstv %s21_s17 }
   0x4   :  { %580 = vmatprep.subr.bf16.mxu0 %v579_v4  ;;  %v41_v13 = vld [vmem:[%s969_s3 + $0x58] sm:$0xff]  ;;  %v585_v14 = vpack.c.bf16 %v36_v11, %v34_v10  ;;  %v38_v16 = vld [vmem:[%s969_s3 + $0x40] sm:$0xff]  ;;  %v40_v17 = vld [vmem:[%s969_s3 + $0x50] sm:$0xff] }
   0x5   :  { %582 = vmatpush1.bf16.msra.mxu0 %v581_v8  ;;  %v587_v15 = vpack.c.bf16 %v41_v13, %v39_v12  ;;  %v43_v18 = vld [vmem:[%s969_s3 + $0x68] sm:$0xff]  ;;  %v45_v19 = vld [vmem:[%s969_s3 + $0x78] sm:$0xff]  ;;  %v589_v20 = vpack.c.bf16 %v40_v17, %v38_v16  ;;  %v42_v22 = vld [vmem:[%s969_s3 + $0x60] sm:$0xff] }
   0x6   :  { %584 = vmatprep.subr.bf16.mxu0 %v583_v9  ;;  %v591_v21 = vpack.c.bf16 %v45_v19, %v43_v18  ;;  %v44_v23 = vld [vmem:[%s969_s3 + $0x70] sm:$0xff]  ;;  %v22_v25 = vld [vmem:[%s970_s1] sm:$0xff]  ;;  %v23_v26 = vld [vmem:[%s970_s1 + $0x8] sm:$0xff] }
   0x7   :  { %v593_v24 = vpack.c.bf16 %v44_v23, %v42_v22  ;;  %v24_v27 = vld [vmem:[%s970_s1 + $0x10] sm:$0xff]  ;;  %v25_v28 = vld [vmem:[%s970_s1 + $0x18] sm:$0xff]  ;;  %v26_v29 = vld [vmem:[%s970_s1 + $0x20] sm:$0xff] }
   0x8   :  { %v27_v30 = vld [vmem:[%s970_s1 + $0x28] sm:$0xff]  ;;  %v28_v31 = vld [vmem:[%s970_s1 + $0x30] sm:$0xff]  ;;  %v29_v32 = vld [vmem:[%s970_s1 + $0x38] sm:$0xff] }
   0x9   :  { %586 = vmatpush1.bf16.msra.mxu0 %v585_v14 }
   0xa   :  { %588 = vmatprep.subr.bf16.mxu0 %v587_v15 }
   0xd   :  { %590 = vmatpush1.bf16.msra.mxu0 %v589_v20 }
   0xe   :  { %592 = vmatprep.subr.bf16.mxu0 %v591_v21 }
  0x11   :  { %594 = vmatpush1.bf16.msra.mxu0 %v593_v24 }
  0x14   :  { %531 = vmatmul.mubr.msk.f32.vlgmr.msra.gmra.mrb[0].mxu0 %vm46_vm0, %v22_v25 }
  0x15   :  { %141 = vmatprep.mubr.f32.mxu0 %v625_v3 }
  0x18   :  { %532 = vmatmul.mubr.msk.f32.gmra.mrb[2].mxu0 %vm46_vm0, %v23_v26 }
  0x19   :  { %147 = vmatprep.mubr.f32.mxu0 %v625_v3 }
  0x1c   :  { %533 = vmatmul.mubr.msk.f32.gmra.mrb[4].mxu0 %vm46_vm0, %v24_v27 }
  0x1d   :  { %153 = vmatprep.mubr.f32.mxu0 %v625_v3 }
  0x20   :  { %534 = vmatmul.mubr.msk.f32.gmra.mrb[6].mxu0 %vm46_vm0, %v25_v28 }
  0x21   :  { %159 = vmatprep.mubr.f32.mxu0 %v625_v3 }
  0x24   :  { %535 = vmatmul.mubr.msk.f32.gmra.mrb[8].mxu0 %vm46_vm0, %v26_v29 }
  0x25   :  { %165 = vmatprep.mubr.f32.mxu0 %v625_v3 }
  0x28   :  { %536 = vmatmul.mubr.msk.f32.gmra.mrb[10].mxu0 %vm46_vm0, %v27_v30 }
  0x29   :  { %171 = vmatprep.mubr.f32.mxu0 %v625_v3 }
  0x2c   :  { %537 = vmatmul.mubr.msk.f32.gmra.mrb[12].mxu0 %vm46_vm0, %v28_v31 }
  0x2d   :  { %177 = vmatprep.mubr.f32.mxu0 %v625_v3 }
  0x30   :  { %538 = vmatmul.mubr.msk.f32.gmra.mrb[14].mxu0 %vm46_vm0, %v29_v32 }
  0xe7   :  { %v137_v33 = vpop.f32.mrb[0].mxu0 }
  0xe8   :  { %v184_v35 = vand.u32 2147483647, %v137_v33  ;;  %v139_v36 = vpop.f32.mrb[1].mxu0 }
  0xe9   :  { %v185_v37 = vand.u32 2147483647, %v139_v36 }
  0xea   :  { %vm752_vm1 = vcmp.gt.f32.partialorder %v184_v35, %v749_v34 }
  0xeb   :  { %v143_v39 = vpop.f32.mrb[2].mxu0  ;;  %vm757_vm2 = vcmp.gt.f32.partialorder %v185_v37, %v749_v34  ;;  %v217_v41 = vsel %vm752_vm1, %v137_v33, 0.0  ;;  %v322_v37 = vld [vmem:[%s972_s2 + $0x38] sm:$0xff] }
  0xec   :  { %v186_v42 = vand.u32 2147483647, %v143_v39  ;;  %v598_v43 = vpack.c.bf16 %v143_v39, %v137_v33  ;;  %v145_v44 = vpop.f32.mrb[3].mxu0  ;;  %v218_v45 = vsel %vm757_vm2, %v139_v36, 0.0  ;;  %vm233_vm4 = vcmp.ne.f32.partialorder %v217_v41, 0.0 }
  0xed   :  { %v187_v46 = vand.u32 2147483647, %v145_v44  ;;  %v595_v47 = vpack.c.bf16 %v145_v44, %v139_v36  ;;  %vm234_vm6 = vcmp.ne.f32.partialorder %v218_v45, 0.0  ;;  %v780_v55 = vsel %vm233_vm4, 1.0, %v625_v3 }
  0xee   :  { %vm766_vm3 = vcmp.gt.f32.partialorder %v186_v42, %v749_v34  ;;  %v789_v58 = vsel %vm234_vm6, 1.0, %v625_v3 }
  0xef   :  { %v149_v49 = vpop.f32.mrb[4].mxu0  ;;  %vm204_vm5 = vcmp.gt.f32.partialorder %v187_v46, %v749_v34  ;;  %v219_v50 = vsel %vm766_vm3, %v143_v39, 0.0  ;;  %vm599_vm7 = vmpackc.low %vm766_vm3, %vm752_vm1 }
  0xf0   :  { %v188_v51 = vand.u32 2147483647, %v149_v49  ;;  %v151_v52 = vpop.f32.mrb[5].mxu0  ;;  %v220_v53 = vsel %vm204_vm5, %v145_v44, 0.0  ;;  %vm596_vm8 = vmpackc.low %vm204_vm5, %vm757_vm2  ;;  %vm235_vm9 = vcmp.ne.f32.partialorder %v219_v50, 0.0 }
  0xf1   :  { %v189_v54 = vand.u32 2147483647, %v151_v52  ;;  %vm236_vm10 = vcmp.ne.f32.partialorder %v220_v53, 0.0  ;;  %597 = vmatprep.subr.msk.bf16.mxu1 %vm596_vm8, %v595_v47  ;;  %v541_v56 = vsel %vm235_vm9, 1.0, %v625_v3 }
  0xf2   :  { %vm784_vm11 = vcmp.gt.f32.partialorder %v188_v51, %v749_v34  ;;  %v542_v59 = vsel %vm236_vm10, 1.0, %v625_v3  ;;  %v281_v60 = vadd.f32 %v541_v56, %v780_v55  ;;  %600 = vmatpush1.bf16.msk.msra.mxu1 %vm599_vm7, %v598_v43 }
  0xf3   :  { %v221_v61 = vsel %vm784_vm11, %v149_v49, 0.0  ;;  %vm796_vm12 = vcmp.gt.f32.partialorder %v189_v54, %v749_v34  ;;  %v294_v63 = vadd.f32 %v542_v59, %v789_v58  ;;  %v155_v0 = vpop.f32.mrb[6].mxu0 }
  0xf4   :  { %vm237_vm13 = vcmp.ne.f32.partialorder %v221_v61, 0.0  ;;  %v222_v1 = vsel %vm796_vm12, %v151_v52, 0.0  ;;  %v190_v2 = vand.u32 2147483647, %v155_v0  ;;  %v604_v4 = vpack.c.bf16 %v155_v0, %v149_v49  ;;  %v157_v5 = vpop.f32.mrb[7].mxu0 }
  0xf5   :  { %v543_v6 = vsel %vm237_vm13, 1.0, %v625_v3  ;;  %vm238_vm14 = vcmp.ne.f32.partialorder %v222_v1, 0.0  ;;  %v191_v7 = vand.u32 2147483647, %v157_v5  ;;  %v601_v8 = vpack.c.bf16 %v157_v5, %v151_v52 }
  0xf6   :  { %v544_v9 = vsel %vm238_vm14, 1.0, %v625_v3  ;;  %vm806_vm15 = vcmp.gt.f32.partialorder %v190_v2, %v749_v34  ;;  %v282_v11 = vadd.f32 %v543_v6, %v281_v60 }
  0xf7   :  { %v295_v12 = vadd.f32 %v544_v9, %v294_v63  ;;  %v223_v13 = vsel %vm806_vm15, %v155_v0, 0.0  ;;  %vm208_vm1 = vcmp.gt.f32.partialorder %v191_v7, %v749_v34  ;;  %v161_v14 = vpop.f32.mrb[8].mxu0  ;;  %vm605_vm2 = vmpackc.low %vm806_vm15, %vm784_vm11 }
  0xf8   :  { %vm239_vm3 = vcmp.ne.f32.partialorder %v223_v13, 0.0  ;;  %v224_v15 = vsel %vm208_vm1, %v157_v5, 0.0  ;;  %v192_v16 = vand.u32 2147483647, %v161_v14  ;;  %v163_v17 = vpop.f32.mrb[9].mxu0  ;;  %vm602_vm4 = vmpackc.low %vm208_vm1, %vm796_vm12 }
  0xf9   :  { %v545_v18 = vsel %vm239_vm3, 1.0, %v625_v3  ;;  %vm240_vm5 = vcmp.ne.f32.partialorder %v224_v15, 0.0  ;;  %v193_v19 = vand.u32 2147483647, %v163_v17  ;;  %603 = vmatprep.subr.msk.bf16.mxu1 %vm602_vm4, %v601_v8 }
  0xfa   :  { %v283_v20 = vadd.f32 %v545_v18, %v282_v11  ;;  %v546_v21 = vsel %vm240_vm5, 1.0, %v625_v3  ;;  %vm822_vm6 = vcmp.gt.f32.partialorder %v192_v16, %v749_v34  ;;  %606 = vmatpush1.bf16.msk.msra.mxu1 %vm605_vm2, %v604_v4  ;;  %v316_v11 = vld [vmem:[%s972_s2 + $0x8] sm:$0xff]  ;;  %v317_v16 = vld [vmem:[%s972_s2 + $0x10] sm:$0xff] }
  0xfb   :  { %v296_v23 = vadd.f32 %v546_v21, %v295_v12  ;;  %v225_v24 = vsel %vm822_vm6, %v161_v14, 0.0  ;;  %vm829_vm7 = vcmp.gt.f32.partialorder %v193_v19, %v749_v34  ;;  %v167_v26 = vpop.f32.mrb[10].mxu0  ;;  %v318_v21 = vld [vmem:[%s972_s2 + $0x18] sm:$0xff] }
  0xfc   :  { %vm241_vm8 = vcmp.ne.f32.partialorder %v225_v24, 0.0  ;;  %v226_v27 = vsel %vm829_vm7, %v163_v17, 0.0  ;;  %v194_v28 = vand.u32 2147483647, %v167_v26  ;;  %v610_v29 = vpack.c.bf16 %v167_v26, %v161_v14  ;;  %v169_v30 = vpop.f32.mrb[11].mxu0 }
  0xfd   :  { %v547_v31 = vsel %vm241_vm8, 1.0, %v625_v3  ;;  %vm242_vm9 = vcmp.ne.f32.partialorder %v226_v27, 0.0  ;;  %v195_v32 = vand.u32 2147483647, %v169_v30  ;;  %v607_v33 = vpack.c.bf16 %v169_v30, %v163_v17 }
  0xfe   :  { %v284_v35 = vadd.f32 %v547_v31, %v283_v20  ;;  %v548_v36 = vsel %vm242_vm9, 1.0, %v625_v3  ;;  %vm838_vm10 = vcmp.gt.f32.partialorder %v194_v28, %v749_v34  ;;  %v460_v27 = vlaneseq }
  0xff   :  { %v297_v38 = vadd.f32 %v548_v36, %v296_v23  ;;  %v227_v39 = vsel %vm838_vm10, %v167_v26, 0.0  ;;  %vm212_vm11 = vcmp.gt.f32.partialorder %v195_v32, %v749_v34  ;;  %v173_v40 = vpop.f32.mrb[12].mxu0  ;;  %vm611_vm12 = vmpackc.low %vm838_vm10, %vm822_vm6  ;;  %v319_v26 = vld [vmem:[%s972_s2 + $0x20] sm:$0xff]  ;;  %v321_v32 = vld [vmem:[%s972_s2 + $0x30] sm:$0xff] }
 0x100   :  { %vm243_vm13 = vcmp.ne.f32.partialorder %v227_v39, 0.0  ;;  %v228_v41 = vsel %vm212_vm11, %v169_v30, 0.0  ;;  %v196_v42 = vand.u32 2147483647, %v173_v40  ;;  %v175_v43 = vpop.f32.mrb[13].mxu0  ;;  %vm608_vm14 = vmpackc.low %vm212_vm11, %vm829_vm7  ;;  %vm520_vm11 = vcmp.lt.s32.totalorder %v460_v27, 256 }
 0x101   :  { %v549_v44 = vsel %vm243_vm13, 1.0, %v625_v3  ;;  %vm244_vm15 = vcmp.ne.f32.partialorder %v228_v41, 0.0  ;;  %v197_v45 = vand.u32 2147483647, %v175_v43  ;;  %609 = vmatprep.subr.msk.bf16.mxu1 %vm608_vm14, %v607_v33 }
 0x102   :  { %v285_v46 = vadd.f32 %v549_v44, %v284_v35  ;;  %v550_v47 = vsel %vm244_vm15, 1.0, %v625_v3  ;;  %vm854_vm1 = vcmp.gt.f32.partialorder %v196_v42, %v749_v34  ;;  %612 = vmatpush1.bf16.msk.msra.mxu1 %vm611_vm12, %v610_v29  ;;  %v626_v29 = vmov 1966171168  }
 0x103   :  { %v298_v49 = vadd.f32 %v550_v47, %v297_v38  ;;  %v229_v50 = vsel %vm854_vm1, %v173_v40, 0.0  ;;  %vm861_vm2 = vcmp.gt.f32.partialorder %v197_v45, %v749_v34  ;;  %v179_v52 = vpop.f32.mrb[14].mxu0  ;;  %v504_v30 = vunpack.c.l.s4 %v626_v29 }
 0x104   :  { %vm245_vm3 = vcmp.ne.f32.partialorder %v229_v50, 0.0  ;;  %v230_v53 = vsel %vm861_vm2, %v175_v43, 0.0  ;;  %v198_v54 = vand.u32 2147483647, %v179_v52  ;;  %v616_v56 = vpack.c.bf16 %v179_v52, %v173_v40  ;;  %v181_v57 = vpop.f32.mrb[15].mxu0 }
 0x105   :  { %v551_v59 = vsel %vm245_vm3, 1.0, %v625_v3  ;;  %vm246_vm4 = vcmp.ne.f32.partialorder %v230_v53, 0.0  ;;  %v199_v60 = vand.u32 2147483647, %v181_v57  ;;  %v613_v61 = vpack.c.bf16 %v181_v57, %v175_v43 }
 0x106   :  { %v286_v62 = vadd.f32 %v551_v59, %v285_v46  ;;  %v552_v63 = vsel %vm246_vm4, 1.0, %v625_v3  ;;  %vm215_vm5 = vcmp.gt.f32.partialorder %v198_v54, %v749_v34  ;;  %v505_v31 = vunpack.c.0.s8 %v504_v30 }
 0x107   :  { %v299_v0 = vadd.f32 %v552_v63, %v298_v49  ;;  %v231_v1 = vsel %vm215_vm5, %v179_v52, 0.0  ;;  %vm216_vm6 = vcmp.gt.f32.partialorder %v199_v60, %v749_v34  ;;  %vm617_vm7 = vmpackc.low %vm215_vm5, %vm854_vm1  ;;  %v315_v34 = vld [vmem:[%s972_s2] sm:$0xff] }
 0x108   :  { %vm247_vm8 = vcmp.ne.f32.partialorder %v231_v1, 0.0  ;;  %v232_v2 = vsel %vm216_vm6, %v181_v57, 0.0  ;;  %vm614_vm9 = vmpackc.low %vm216_vm6, %vm861_vm2 }
 0x109   :  { %v553_v4 = vsel %vm247_vm8, 1.0, %v625_v3  ;;  %vm248_vm10 = vcmp.ne.f32.partialorder %v232_v2, 0.0  ;;  %615 = vmatprep.subr.msk.bf16.mxu1 %vm614_vm9, %v613_v61 }
 0x10a   :  { %v287_v5 = vadd.f32 %v553_v4, %v286_v62  ;;  %v554_v6 = vsel %vm248_vm10, 1.0, %v625_v3  ;;  %618 = vmatpush1.bf16.msk.msra.mxu1 %vm617_vm7, %v616_v56 }
 0x10b   :  { %v300_v7 = vadd.f32 %v554_v6, %v299_v0 }
 0x10c   :  { %v288_v8 = vrot.slane %v287_v5, 4 }
 0x10d   :  { %v301_v9 = vrot.slane %v300_v7, 4  ;;  %571 = vmatmul.mubr.msk.f32.vlgmr.msra.gmra.mrb[0].mxu1 %vm46_vm0, %v315_v34 }
 0x10e   :  { %v289_v10 = vadd.f32 %v288_v8, %v287_v5  ;;  %417 = vmatprep.mubr.f32.mxu1 %v625_v3 }
 0x10f   :  { %v302_v12 = vadd.f32 %v301_v9, %v300_v7 }
 0x110   :  { %v290_v13 = vrot.slane %v289_v10, 2 }
 0x111   :  { %v303_v14 = vrot.slane %v302_v12, 2  ;;  %572 = vmatmul.mubr.msk.f32.gmra.mrb[2].mxu1 %vm46_vm0, %v316_v11 }
 0x112   :  { %v291_v15 = vadd.f32 %v290_v13, %v289_v10  ;;  %423 = vmatprep.mubr.f32.mxu1 %v625_v3 }
 0x113   :  { %v304_v17 = vadd.f32 %v303_v14, %v302_v12 }
 0x114   :  { %v292_v18 = vrot.slane %v291_v15, 1 }
 0x115   :  { %v305_v19 = vrot.slane %v304_v17, 1  ;;  %573 = vmatmul.mubr.msk.f32.gmra.mrb[4].mxu1 %vm46_vm0, %v317_v16 }
 0x116   :  { %v293_v20 = vadd.f32 %v292_v18, %v291_v15  ;;  %429 = vmatprep.mubr.f32.mxu1 %v625_v3 }
 0x117   :  { %v306_v22 = vadd.f32 %v305_v19, %v304_v17 }
 0x118   :  { %v307_v23 = vsub.f32 %v293_v20, %v780_v55  ;;  %v320_v55 = vld [vmem:[%s972_s2 + $0x28] sm:$0xff] }
 0x119   :  { %v308_v24 = vsub.f32 %v306_v22, %v789_v58  ;;  %574 = vmatmul.mubr.msk.f32.gmra.mrb[6].mxu1 %vm46_vm0, %v318_v21  ;;  %v461_v58 = vshrl.u32 %v460_v27, 7 }
 0x11a   :  { %v309_v25 = vadd.f32 1.0, %v307_v23  ;;  %435 = vmatprep.mubr.f32.mxu1 %v625_v3 }
 0x11b   :  { %v310_v28 = vadd.f32 1.0, %v308_v24  ;;  %v462_v33 = vsub.s32 0, %v461_v58  ;;  %v508_v36 = vsub.s32 %v505_v31, %v461_v58 }
 0x11c   :  { %621 = vrcp.f32 %v309_v25 }
 0x11d   :  { %623 = vrcp.f32 %v310_v28  ;;  %575 = vmatmul.mubr.msk.f32.gmra.mrb[8].mxu1 %vm46_vm0, %v319_v26 }
 0x11e   :  { %441 = vmatprep.mubr.f32.mxu1 %v625_v3 }
 0x121   :  { %576 = vmatmul.mubr.msk.f32.gmra.mrb[10].mxu1 %vm46_vm0, %v320_v55 }
 0x122   :  { %447 = vmatprep.mubr.f32.mxu1 %v625_v3 }
 0x125   :  { %577 = vmatmul.mubr.msk.f32.gmra.mrb[12].mxu1 %vm46_vm0, %v321_v32 }
 0x126   :  { %v622_v35 = vpop.eup %621  ;;  %453 = vmatprep.mubr.f32.mxu1 %v625_v3 }
 0x127   :  { %v624_v38 = vpop.eup %623  ;;  %v463_v39 = vrot.slane %v622_v35, %v462_v33 }
 0x128   :  { %v467_v40 = vrot.slane %v624_v38, %v462_v33  ;;  %v502_v41 = vcombine.low %v622_v35, %v624_v38 }
 0x129   :  { %578 = vmatmul.mubr.msk.f32.gmra.mrb[14].mxu1 %vm46_vm0, %v322_v37 }
 0x12a   :  { %v509_v42 = vrot.slane %v502_v41, %v508_v36 }
 0x12c   :  { %v516_v43 = vrot.slane %v509_v42, %v508_v36 }
 0x12e   :  { %522 = vst.msk [vmem:[%s973_s5] sm:$0x3] %vm520_vm11, %v516_v43 }
 0x1e0   :  { %v413_v44 = vpop.f32.mrb[0].mxu1 }
 0x1e1   :  { %v468_v45 = vmul.f32 %v463_v39, %v413_v44  ;;  %v415_v3 = vpop.f32.mrb[1].mxu1 }
 0x1e2   :  { %v469_v46 = vmul.f32 %v467_v40, %v415_v3 }
 0x1e3   :  { %484 = vst [vmem:[%s974_s4] sm:$0xff] %v468_v45 }
 0x1e4   :  { %485 = vst [vmem:[%s974_s4 + $0x8] sm:$0xff] %v469_v46  ;;  %v419_v47 = vpop.f32.mrb[2].mxu1 }
 0x1e5   :  { %v470_v48 = vmul.f32 %v463_v39, %v419_v47  ;;  %v421_v49 = vpop.f32.mrb[3].mxu1 }
 0x1e6   :  { %v471_v50 = vmul.f32 %v467_v40, %v421_v49 }
 0x1e7   :  { %486 = vst [vmem:[%s974_s4 + $0x10] sm:$0xff] %v470_v48 }
 0x1e8   :  { %487 = vst [vmem:[%s974_s4 + $0x18] sm:$0xff] %v471_v50  ;;  %v425_v51 = vpop.f32.mrb[4].mxu1 }
 0x1e9   :  { %v472_v52 = vmul.f32 %v463_v39, %v425_v51  ;;  %v427_v53 = vpop.f32.mrb[5].mxu1 }
 0x1ea   :  { %v473_v54 = vmul.f32 %v467_v40, %v427_v53 }
 0x1eb   :  { %488 = vst [vmem:[%s974_s4 + $0x20] sm:$0xff] %v472_v52 }
 0x1ec   :  { %489 = vst [vmem:[%s974_s4 + $0x28] sm:$0xff] %v473_v54  ;;  %v431_v56 = vpop.f32.mrb[6].mxu1 }
 0x1ed   :  { %v474_v57 = vmul.f32 %v463_v39, %v431_v56  ;;  %v433_v59 = vpop.f32.mrb[7].mxu1 }
 0x1ee   :  { %v475_v60 = vmul.f32 %v467_v40, %v433_v59 }
 0x1ef   :  { %490 = vst [vmem:[%s974_s4 + $0x30] sm:$0xff] %v474_v57 }
 0x1f0   :  { %491 = vst [vmem:[%s974_s4 + $0x38] sm:$0xff] %v475_v60  ;;  %v437_v61 = vpop.f32.mrb[8].mxu1 }
 0x1f1   :  { %v476_v62 = vmul.f32 %v463_v39, %v437_v61  ;;  %v439_v63 = vpop.f32.mrb[9].mxu1 }
 0x1f2   :  { %v477_v0 = vmul.f32 %v467_v40, %v439_v63 }
 0x1f3   :  { %492 = vst [vmem:[%s974_s4 + $0x40] sm:$0xff] %v476_v62 }
 0x1f4   :  { %493 = vst [vmem:[%s974_s4 + $0x48] sm:$0xff] %v477_v0  ;;  %v443_v1 = vpop.f32.mrb[10].mxu1 }
 0x1f5   :  { %v478_v2 = vmul.f32 %v463_v39, %v443_v1  ;;  %v445_v4 = vpop.f32.mrb[11].mxu1 }
 0x1f6   :  { %v479_v5 = vmul.f32 %v467_v40, %v445_v4 }
 0x1f7   :  { %494 = vst [vmem:[%s974_s4 + $0x50] sm:$0xff] %v478_v2 }
 0x1f8   :  { %495 = vst [vmem:[%s974_s4 + $0x58] sm:$0xff] %v479_v5  ;;  %v449_v6 = vpop.f32.mrb[12].mxu1 }
 0x1f9   :  { %v480_v34 = vmul.f32 %v463_v39, %v449_v6  ;;  %v451_v7 = vpop.f32.mrb[13].mxu1 }
 0x1fa   :  { %v481_v8 = vmul.f32 %v467_v40, %v451_v7 }
 0x1fb   :  { %496 = vst [vmem:[%s974_s4 + $0x60] sm:$0xff] %v480_v34 }
 0x1fc   :  { %497 = vst [vmem:[%s974_s4 + $0x68] sm:$0xff] %v481_v8  ;;  %v455_v9 = vpop.f32.mrb[14].mxu1 }
 0x1fd   :  { %v482_v10 = vmul.f32 %v463_v39, %v455_v9  ;;  %v457_v11 = vpop.f32.mrb[15].mxu1 }
 0x1fe   :  { %v483_v12 = vmul.f32 %v467_v40, %v457_v11 }
 0x1ff   :  { %498 = vst [vmem:[%s974_s4 + $0x70] sm:$0xff] %v482_v10 }
 0x200   :  { %499 = vst [vmem:[%s974_s4 + $0x78] sm:$0xff] %v483_v12 }

// kernel: div.1
= control target key start
LH: loop header
LB: loop body
LE: loop exit
PB: predicated region body
PF: predicated region fallthrough
CT: control target
= control target key end

     0   :  { %s412_s0 = inlined_call_operand.vmem [shape: f32[2,1,16,16], index: 0, kind: input, shape index: {}]   ;;  %s413_s1 = inlined_call_operand.vmem [shape: f32[2,1,16,16], index: 1, kind: input, shape index: {}]   ;;  %s414_s2 = inlined_call_operand.vmem [shape: f32[2,1,16,16], index: 2, kind: output, shape index: {}]  }
   0x1   :  { %v4_v0 = vld [vmem:[%s413_s1] sm:$0x3]  ;;  %v177_v1 = vld [vmem:[%s413_s1 + $0x2] sm:$0x3]  ;;  %v180_v2 = vld [vmem:[%s413_s1 + $0x4] sm:$0x3] }
   0x2   :  { %221 = vrcp.f32 %v4_v0  ;;  %v183_v3 = vld [vmem:[%s413_s1 + $0x6] sm:$0x3]  ;;  %v186_v4 = vld [vmem:[%s413_s1 + $0x8] sm:$0x3]  ;;  %v189_v5 = vld [vmem:[%s413_s1 + $0xa] sm:$0x3] }
   0x3   :  { %223 = vrcp.f32 %v177_v1  ;;  %v192_v6 = vld [vmem:[%s413_s1 + $0xc] sm:$0x3]  ;;  %v195_v7 = vld [vmem:[%s413_s1 + $0xe] sm:$0x3]  ;;  %v198_v8 = vld [vmem:[%s413_s1 + $0x10] sm:$0x3] }
   0x4   :  { %225 = vrcp.f32 %v180_v2  ;;  %v201_v9 = vld [vmem:[%s413_s1 + $0x12] sm:$0x3]  ;;  %v204_v10 = vld [vmem:[%s413_s1 + $0x14] sm:$0x3]  ;;  %v3_v11 = vld [vmem:[%s412_s0] sm:$0x3] }
   0x5   :  { %227 = vrcp.f32 %v183_v3  ;;  %v207_v12 = vld [vmem:[%s413_s1 + $0x16] sm:$0x3]  ;;  %v176_v13 = vld [vmem:[%s412_s0 + $0x2] sm:$0x3]  ;;  %v210_v14 = vld [vmem:[%s413_s1 + $0x18] sm:$0x3] }
   0x6   :  { %229 = vrcp.f32 %v186_v4  ;;  %v179_v16 = vld [vmem:[%s412_s0 + $0x4] sm:$0x3]  ;;  %v213_v17 = vld [vmem:[%s413_s1 + $0x1a] sm:$0x3]  ;;  %v182_v20 = vld [vmem:[%s412_s0 + $0x6] sm:$0x3] }
   0x7   :  { %231 = vrcp.f32 %v189_v5  ;;  %v216_v21 = vld [vmem:[%s413_s1 + $0x1c] sm:$0x3]  ;;  %v185_v24 = vld [vmem:[%s412_s0 + $0x8] sm:$0x3]  ;;  %v219_v25 = vld [vmem:[%s413_s1 + $0x1e] sm:$0x3] }
   0x8   :  { %233 = vrcp.f32 %v192_v6  ;;  %v188_v28 = vld [vmem:[%s412_s0 + $0xa] sm:$0x3]  ;;  %v191_v31 = vld [vmem:[%s412_s0 + $0xc] sm:$0x3]  ;;  %v194_v34 = vld [vmem:[%s412_s0 + $0xe] sm:$0x3] }
   0x9   :  { %235 = vrcp.f32 %v195_v7  ;;  %v197_v37 = vld [vmem:[%s412_s0 + $0x10] sm:$0x3]  ;;  %v200_v40 = vld [vmem:[%s412_s0 + $0x12] sm:$0x3]  ;;  %v203_v43 = vld [vmem:[%s412_s0 + $0x14] sm:$0x3] }
   0xa   :  { %237 = vrcp.f32 %v198_v8  ;;  %v206_v46 = vld [vmem:[%s412_s0 + $0x16] sm:$0x3]  ;;  %v209_v49 = vld [vmem:[%s412_s0 + $0x18] sm:$0x3]  ;;  %v212_v52 = vld [vmem:[%s412_s0 + $0x1a] sm:$0x3] }
   0xb   :  { %239 = vrcp.f32 %v201_v9  ;;  %v215_v55 = vld [vmem:[%s412_s0 + $0x1c] sm:$0x3]  ;;  %v218_v58 = vld [vmem:[%s412_s0 + $0x1e] sm:$0x3] }
   0xc   :  { %v222_v15 = vpop.eup %221  ;;  %241 = vrcp.f32 %v204_v10 }
   0xd   :  { %v224_v18 = vpop.eup %223  ;;  %v8_v19 = vmul.f32 %v222_v15, %v3_v11  ;;  %243 = vrcp.f32 %v207_v12 }
   0xe   :  { %v226_v22 = vpop.eup %225  ;;  %v18_v23 = vmul.f32 %v224_v18, %v176_v13  ;;  %245 = vrcp.f32 %v210_v14 }
   0xf   :  { %v228_v26 = vpop.eup %227  ;;  %10 = vst [vmem:[%s414_s2] sm:$0x3] %v8_v19  ;;  %v29_v27 = vmul.f32 %v226_v22, %v179_v16  ;;  %247 = vrcp.f32 %v213_v17 }
  0x10   :  { %v230_v29 = vpop.eup %229  ;;  %178 = vst [vmem:[%s414_s2 + $0x2] sm:$0x3] %v18_v23  ;;  %v40_v30 = vmul.f32 %v228_v26, %v182_v20  ;;  %249 = vrcp.f32 %v216_v21 }
  0x11   :  { %v232_v32 = vpop.eup %231  ;;  %181 = vst [vmem:[%s414_s2 + $0x4] sm:$0x3] %v29_v27  ;;  %v51_v33 = vmul.f32 %v230_v29, %v185_v24  ;;  %251 = vrcp.f32 %v219_v25 }
  0x12   :  { %v234_v35 = vpop.eup %233  ;;  %184 = vst [vmem:[%s414_s2 + $0x6] sm:$0x3] %v40_v30  ;;  %v62_v36 = vmul.f32 %v232_v32, %v188_v28 }
  0x13   :  { %v236_v38 = vpop.eup %235  ;;  %187 = vst [vmem:[%s414_s2 + $0x8] sm:$0x3] %v51_v33  ;;  %v73_v39 = vmul.f32 %v234_v35, %v191_v31 }
  0x14   :  { %v238_v41 = vpop.eup %237  ;;  %190 = vst [vmem:[%s414_s2 + $0xa] sm:$0x3] %v62_v36  ;;  %v84_v42 = vmul.f32 %v236_v38, %v194_v34 }
  0x15   :  { %v240_v44 = vpop.eup %239  ;;  %193 = vst [vmem:[%s414_s2 + $0xc] sm:$0x3] %v73_v39  ;;  %v95_v45 = vmul.f32 %v238_v41, %v197_v37 }
  0x16   :  { %v242_v47 = vpop.eup %241  ;;  %196 = vst [vmem:[%s414_s2 + $0xe] sm:$0x3] %v84_v42  ;;  %v106_v48 = vmul.f32 %v240_v44, %v200_v40 }
  0x17   :  { %v244_v50 = vpop.eup %243  ;;  %199 = vst [vmem:[%s414_s2 + $0x10] sm:$0x3] %v95_v45  ;;  %v117_v51 = vmul.f32 %v242_v47, %v203_v43 }
  0x18   :  { %v246_v53 = vpop.eup %245  ;;  %202 = vst [vmem:[%s414_s2 + $0x12] sm:$0x3] %v106_v48  ;;  %v128_v54 = vmul.f32 %v244_v50, %v206_v46 }
  0x19   :  { %v248_v56 = vpop.eup %247  ;;  %205 = vst [vmem:[%s414_s2 + $0x14] sm:$0x3] %v117_v51  ;;  %v139_v57 = vmul.f32 %v246_v53, %v209_v49 }
  0x1a   :  { %v250_v59 = vpop.eup %249  ;;  %208 = vst [vmem:[%s414_s2 + $0x16] sm:$0x3] %v128_v54  ;;  %v150_v60 = vmul.f32 %v248_v56, %v212_v52 }
  0x1b   :  { %v252_v61 = vpop.eup %251  ;;  %211 = vst [vmem:[%s414_s2 + $0x18] sm:$0x3] %v139_v57  ;;  %v161_v62 = vmul.f32 %v250_v59, %v215_v55 }
  0x1c   :  { %214 = vst [vmem:[%s414_s2 + $0x1a] sm:$0x3] %v150_v60  ;;  %v172_v63 = vmul.f32 %v252_v61, %v218_v58 }
  0x1d   :  { %217 = vst [vmem:[%s414_s2 + $0x1c] sm:$0x3] %v161_v62 }
  0x1e   :  { %220 = vst [vmem:[%s414_s2 + $0x1e] sm:$0x3] %v172_v63 }

</bundles_post_ra>
